<compile_context>
chip_gen: v7x
topology: tpu7x:2x2x1
jax: 0.10.0
libtpu: 0.0.40
codegen_flags: <defaults>
</compile_context>

<pallas_src>
import functools

import jax
import jax.numpy as jnp
from jax.experimental import pallas as pl
from jax.experimental.pallas import tpu as pltpu


_LANE = 128      # lane width: feature dims padded to a multiple of this
_SUBLANE = 8     # f32 sublane packing for the batch dim


def _round_up(n, m):
    return ((n + m - 1) // m) * m


def _fused_mlp_kernel(*refs, layer_out_pads, matmul_dtype):
    """refs = (x, w_0, ..., w_{L-1}, b_all, out).

    Chains act(h @ W_l + b_l) over all layers on a single VMEM-resident batch
    tile.  Hidden layers use ReLU; the last layer uses a stable sigmoid.
    Weights arrive already cast to `matmul_dtype`; biases arrive as one
    concatenated f32 row, sliced with static 128-aligned offsets.
    """
    num_layers = len(layer_out_pads)
    x_ref = refs[0]
    w_refs = refs[1:1 + num_layers]
    b_ref = refs[1 + num_layers]
    o_ref = refs[2 + num_layers]

    h = x_ref[...]                                   # already matmul_dtype
    off = 0
    for l, d_out in enumerate(layer_out_pads):
        w = w_refs[l][...]                           # pre-cast, no per-step astype
        b = b_ref[:, off:off + d_out]                # static, lane-aligned slice (f32)
        off += d_out
        y = jnp.dot(h.astype(matmul_dtype), w,
                    preferred_element_type=jnp.float32)
        y = y + b                                    # (1, d_out) broadcasts over rows
        if l < num_layers - 1:
            h = jnp.maximum(y, 0.0)                  # ReLU (f32, VPU)
        else:
            # numerically stable sigmoid: exp(-|y|) on EUP, approx recip on EUP
            z = jnp.exp(-jnp.abs(y))
            inv = pl.reciprocal(1.0 + z, approx=True)
            h = jnp.where(y >= 0.0, inv, z * inv)
    o_ref[...] = h.astype(o_ref.dtype)


@functools.partial(jax.jit, static_argnames=("out_dim", "max_batch_tile"))
def mlp_forward(x, w_pads, b_all, *, out_dim, max_batch_tile=512):
    """Fused MLP forward on pre-padded params.

    x:       (B, in_dim) f32
    w_pads:  tuple of padded weights, layer l has shape (in_pad_l, out_pad_l),
             dtype = matmul dtype (bf16 by default)
    b_all:   (1, sum(out_pad_l)) f32, concatenation of padded biases
    """
    B, in_dim = x.shape
    matmul_dtype = jnp.dtype(w_pads[0].dtype)
    in_pad = int(w_pads[0].shape[0])
    layer_out_pads = tuple(int(w.shape[1]) for w in w_pads)
    out_pad = layer_out_pads[-1]

    # --- batch tile selection -------------------------------------------------
    max_batch_tile = max(_SUBLANE, _round_up(int(max_batch_tile), _SUBLANE))
    b_pad8 = _round_up(B, _SUBLANE)
    if b_pad8 >= max_batch_tile:
        tm = max_batch_tile
    elif b_pad8 >= 2 * _SUBLANE:
        # split small batches into >= 2 tiles so both v7x TensorCores get work
        tm = _round_up((b_pad8 + 1) // 2, _SUBLANE)
    else:
        tm = b_pad8
    b_pad = _round_up(B, tm)

    # --- pad + cast x only (weights/biases were padded once in __init__) -----
    x_p = jnp.zeros((b_pad, in_pad), matmul_dtype).at[:B, :in_dim].set(
        x.astype(matmul_dtype))

    # --- block specs ----------------------------------------------------------
    in_specs = [pl.BlockSpec((tm, in_pad), lambda i: (i, 0))]
    for w_p in w_pads:
        # constant index_map -> VMEM resident; single-buffered (no need to
        # double-buffer an operand that never changes across grid steps).
        in_specs.append(pl.BlockSpec(w_p.shape, lambda i: (0, 0),
                                     pipeline_mode=pl.Buffered(1)))
    in_specs.append(pl.BlockSpec(b_all.shape, lambda i: (0, 0),
                                 pipeline_mode=pl.Buffered(1)))
    out_spec = pl.BlockSpec((tm, out_pad), lambda i: (i, 0))

    # --- explicit VMEM budget -------------------------------------------------
    w_bytes = sum(int(w.shape[0]) * int(w.shape[1]) * jnp.dtype(w.dtype).itemsize
                  for w in w_pads)
    b_bytes = int(b_all.shape[1]) * 4
    x_tile_bytes = 2 * tm * in_pad * jnp.dtype(matmul_dtype).itemsize   # double-buffered
    o_tile_bytes = 2 * tm * out_pad * 4                                  # double-buffered
    act_bytes = 2 * tm * max(layer_out_pads + (in_pad,)) * 4             # temporaries headroom
    needed = w_bytes + b_bytes + x_tile_bytes + o_tile_bytes + act_bytes
    vmem_limit = int(min(max(needed + (4 << 20), 16 << 20), 96 << 20))

    y_p = pl.pallas_call(
        functools.partial(_fused_mlp_kernel,
                          layer_out_pads=layer_out_pads,
                          matmul_dtype=matmul_dtype),
        out_shape=jax.ShapeDtypeStruct((b_pad, out_pad), jnp.float32),
        grid=(b_pad // tm,),
        in_specs=in_specs,
        out_specs=out_spec,
        compiler_params=pltpu.CompilerParams(
            dimension_semantics=("parallel",),
            vmem_limit_bytes=vmem_limit),
    )(x_p, *w_pads, b_all)

    return y_p[:B, :out_dim]


class Generator:
    """JAX/Pallas port of the PyTorch Generator module (forward pass only)."""

    def __init__(self, input_size, hidden_sizes, output_size, key,
                 matmul_dtype=jnp.bfloat16, max_batch_tile=512):
        # bf16 is MXU-native on v5e/v6e/v7x; accumulation stays f32 in-kernel.
        self.matmul_dtype = jnp.dtype(matmul_dtype)
        self.max_batch_tile = int(max_batch_tile)
        self.out_dim = int(output_size)

        # raw f32 params (PyTorch-layout-transposed: W is (in, out)) ----------
        self.params = []
        dims = [input_size] + list(hidden_sizes) + [output_size]
        for i in range(len(dims) - 1):
            fan_in, fan_out = dims[i], dims[i + 1]
            key, kw, kb = jax.random.split(key, 3)
            bound = 1.0 / float(fan_in) ** 0.5     # mimic nn.Linear default init
            w = jax.random.uniform(kw, (fan_in, fan_out), jnp.float32, -bound, bound)
            b = jax.random.uniform(kb, (1, fan_out), jnp.float32, -bound, bound)
            self.params.append((w, b))

        # pad + cast ONCE here (hoisted out of the forward hot path) ----------
        w_pads, b_cols = [], []
        d_in_pad = _round_up(input_size, _LANE)
        for w, b in self.params:
            d_in, d_out = w.shape
            d_out_pad = _round_up(d_out, _LANE)
            # zero padding keeps semantics exact: padded lanes carry 0 through
            # Linear+ReLU, and padded sigmoid lanes are sliced off at the end.
            w_p = (jnp.zeros((d_in_pad, d_out_pad), jnp.float32)
                   .at[:d_in, :d_out].set(w)
                   .astype(self.matmul_dtype))
            b_p = jnp.zeros((1, d_out_pad), jnp.float32).at[:, :d_out].set(b)
            w_pads.append(w_p)
            b_cols.append(b_p)
            d_in_pad = d_out_pad
        self.w_pads = tuple(w_pads)
        self.b_all = jnp.concatenate(b_cols, axis=1)      # (1, sum(out_pad)), f32

    def __call__(self, x):
        return mlp_forward(x, self.w_pads, self.b_all,
                           out_dim=self.out_dim,
                           max_batch_tile=self.max_batch_tile)


def _reference(params, x, matmul_dtype=jnp.float32):
    """Pure-JAX reference (optionally with the same bf16 operand rounding)."""
    h = x
    for w, b in params[:-1]:
        y = jnp.dot(h.astype(matmul_dtype), w.astype(matmul_dtype),
                    preferred_element_type=jnp.float32) + b
        h = jnp.maximum(y, 0.0)
    w, b = params[-1]
    y = jnp.dot(h.astype(matmul_dtype), w.astype(matmul_dtype),
                preferred_element_type=jnp.float32) + b
    return jax.nn.sigmoid(y)


if __name__ == "__main__":
    key = jax.random.PRNGKey(0)
    k_in1, k_in2, k_in3, k_model = jax.random.split(key, 4)

    input_size = 32
    hidden_sizes = [64, 32]
    output_size = 16

    # two models with identical raw params (same key): f32 path for a tight
    # check, bf16 path (default / production) with matching-rounding reference.
    gen_f32 = Generator(input_size, hidden_sizes, output_size, k_model,
                        matmul_dtype=jnp.float32)
    gen_bf16 = Generator(input_size, hidden_sizes, output_size, k_model)

    # batch=8  -> single tile, grid=(1,)
    # batch=24 -> small-batch split into 2 tiles (tm=16), exercises batch padding
    # batch=520-> tm=512, grid=(2,), exercises batch padding at the big tile
    for batch, k in ((8, k_in1), (24, k_in2), (520, k_in3)):
        x = jax.random.normal(k, (batch, input_size), jnp.float32)

        out_f32 = jax.block_until_ready(gen_f32(x))
        ref_f32 = _reference(gen_f32.params, x, jnp.float32)
        assert out_f32.shape == (batch, output_size), out_f32.shape
        assert jnp.allclose(out_f32, ref_f32, atol=2e-3, rtol=0.0), \
            f"f32 mismatch vs reference (batch={batch})"

        out_bf16 = jax.block_until_ready(gen_bf16(x))
        ref_bf16 = _reference(gen_bf16.params, x, jnp.bfloat16)
        assert out_bf16.shape == (batch, output_size), out_bf16.shape
        assert jnp.allclose(out_bf16, ref_bf16, atol=2e-3, rtol=0.0), \
            f"bf16 mismatch vs bf16 reference (batch={batch})"
        assert jnp.allclose(out_bf16, ref_f32, atol=3e-2, rtol=0.0), \
            f"bf16 mismatch vs f32 reference (batch={batch})"

    print("KERNEL_OK")
</pallas_src>

<mosaic_0001>
module attributes {stable_mosaic.version = 11 : i64} {
  func.func @_fused_mlp_kernel(%arg0: i32, %arg1: memref<8x128xf32, #tpu.memory_space<vmem>>, %arg2: memref<128x128xf32, #tpu.memory_space<vmem>>, %arg3: memref<128x128xf32, #tpu.memory_space<vmem>>, %arg4: memref<128x128xf32, #tpu.memory_space<vmem>>, %arg5: memref<1x384xf32, #tpu.memory_space<vmem>>, %arg6: memref<8x128xf32, #tpu.memory_space<vmem>>) attributes {dimension_semantics = [#tpu.dimension_semantics<parallel>], iteration_bounds = array<i64: 1>, scalar_prefetch = 0 : i64, scratch_operands = 0 : i64, tpu.core_type = #tpu.core_type<tc>, window_params = [{transform_indices = @transform_0, window_bounds = array<i64: 8, 128>}, {pipeline_mode = #tpu.pipeline_mode<synchronous>, transform_indices = @transform_1, window_bounds = array<i64: 128, 128>}, {pipeline_mode = #tpu.pipeline_mode<synchronous>, transform_indices = @transform_2, window_bounds = array<i64: 128, 128>}, {pipeline_mode = #tpu.pipeline_mode<synchronous>, transform_indices = @transform_3, window_bounds = array<i64: 128, 128>}, {pipeline_mode = #tpu.pipeline_mode<synchronous>, transform_indices = @transform_4, window_bounds = array<i64: 1, 384>}, {transform_indices = @transform_5, window_bounds = array<i64: 8, 128>}]} {
    %c0 = arith.constant 0 : index
    %c0_0 = arith.constant 0 : index
    %0 = vector.load %arg1[%c0, %c0_0] : memref<8x128xf32, #tpu.memory_space<vmem>>, vector<8x128xf32>
    %c0_1 = arith.constant 0 : index
    %c0_2 = arith.constant 0 : index
    %1 = vector.load %arg2[%c0_1, %c0_2] : memref<128x128xf32, #tpu.memory_space<vmem>>, vector<128x128xf32>
    %c0_3 = arith.constant 0 : index
    %c0_4 = arith.constant 0 : index
    %2 = vector.load %arg5[%c0_3, %c0_4] : memref<1x384xf32, #tpu.memory_space<vmem>>, vector<1x128xf32>
    %cst = arith.constant dense<0.000000e+00> : vector<8x128xf32>
    %3 = tpu.matmul %0, %1, %cst {dimension_numbers = #tpu.dot_dimension_numbers<[1], [0], [0], [1], [0, 0, 1, 1], [], []>} : vector<8x128xf32>, vector<128x128xf32>, vector<8x128xf32> -> vector<8x128xf32>
    %4 = vector.broadcast %2 : vector<1x128xf32> to vector<8x128xf32>
    %5 = arith.addf %3, %4 : vector<8x128xf32>
    %cst_5 = arith.constant 0.000000e+00 : f32
    %6 = vector.broadcast %cst_5 : f32 to vector<8x128xf32>
    %7 = arith.maximumf %5, %6 : vector<8x128xf32>
    %c0_6 = arith.constant 0 : index
    %c0_7 = arith.constant 0 : index
    %8 = vector.load %arg3[%c0_6, %c0_7] : memref<128x128xf32, #tpu.memory_space<vmem>>, vector<128x128xf32>
    %c0_8 = arith.constant 0 : index
    %c128 = arith.constant 128 : index
    %9 = vector.load %arg5[%c0_8, %c128] : memref<1x384xf32, #tpu.memory_space<vmem>>, vector<1x128xf32>
    %cst_9 = arith.constant dense<0.000000e+00> : vector<8x128xf32>
    %10 = tpu.matmul %7, %8, %cst_9 {dimension_numbers = #tpu.dot_dimension_numbers<[1], [0], [0], [1], [0, 0, 1, 1], [], []>} : vector<8x128xf32>, vector<128x128xf32>, vector<8x128xf32> -> vector<8x128xf32>
    %11 = vector.broadcast %9 : vector<1x128xf32> to vector<8x128xf32>
    %12 = arith.addf %10, %11 : vector<8x128xf32>
    %cst_10 = arith.constant 0.000000e+00 : f32
    %13 = vector.broadcast %cst_10 : f32 to vector<8x128xf32>
    %14 = arith.maximumf %12, %13 : vector<8x128xf32>
    %c0_11 = arith.constant 0 : index
    %c0_12 = arith.constant 0 : index
    %15 = vector.load %arg4[%c0_11, %c0_12] : memref<128x128xf32, #tpu.memory_space<vmem>>, vector<128x128xf32>
    %c0_13 = arith.constant 0 : index
    %c256 = arith.constant 256 : index
    %16 = vector.load %arg5[%c0_13, %c256] : memref<1x384xf32, #tpu.memory_space<vmem>>, vector<1x128xf32>
    %cst_14 = arith.constant dense<0.000000e+00> : vector<8x128xf32>
    %17 = tpu.matmul %14, %15, %cst_14 {dimension_numbers = #tpu.dot_dimension_numbers<[1], [0], [0], [1], [0, 0, 1, 1], [], []>} : vector<8x128xf32>, vector<128x128xf32>, vector<8x128xf32> -> vector<8x128xf32>
    %18 = vector.broadcast %16 : vector<1x128xf32> to vector<8x128xf32>
    %19 = arith.addf %17, %18 : vector<8x128xf32>
    %20 = math.absf %19 : vector<8x128xf32>
    %cst_15 = arith.constant 0.000000e+00 : f32
    %21 = vector.broadcast %cst_15 : f32 to vector<8x128xf32>
    %22 = arith.subf %21, %20 : vector<8x128xf32>
    %23 = math.exp %22 : vector<8x128xf32>
    %cst_16 = arith.constant 1.000000e+00 : f32
    %24 = vector.broadcast %cst_16 : f32 to vector<8x128xf32>
    %25 = arith.addf %24, %23 : vector<8x128xf32>
    %26 = tpu.reciprocal %25 {approx = true} : vector<8x128xf32> -> vector<8x128xf32>
    %cst_17 = arith.constant 0.000000e+00 : f32
    %27 = vector.broadcast %cst_17 : f32 to vector<8x128xf32>
    %28 = arith.cmpf oge, %19, %27 : vector<8x128xf32>
    %29 = arith.mulf %23, %26 : vector<8x128xf32>
    %30 = arith.select %28, %26, %29 : vector<8x128xi1>, vector<8x128xf32>
    %c0_18 = arith.constant 0 : index
    %c0_19 = arith.constant 0 : index
    %31 = vector.load %arg6[%c0_18, %c0_19] : memref<8x128xf32, #tpu.memory_space<vmem>>, vector<8x128xf32>
    tpu.vector_store %arg6[%c0_18, %c0_19], %30 {strides = array<i32>} : memref<8x128xf32, #tpu.memory_space<vmem>>, vector<8x128xf32>,
    return
  }
  func.func @transform_0(%arg0: i32) -> (i32, i32) {
    %c0_i32 = arith.constant 0 : i32
    %c0_i32_0 = arith.constant 0 : i32
    return %arg0, %c0_i32 : i32, i32
  }
  func.func @transform_1(%arg0: i32) -> (i32, i32) {
    %c0_i32 = arith.constant 0 : i32
    %c0_i32_0 = arith.constant 0 : i32
    %c0_i32_1 = arith.constant 0 : i32
    return %c0_i32, %c0_i32_0 : i32, i32
  }
  func.func @transform_2(%arg0: i32) -> (i32, i32) {
    %c0_i32 = arith.constant 0 : i32
    %c0_i32_0 = arith.constant 0 : i32
    %c0_i32_1 = arith.constant 0 : i32
    return %c0_i32, %c0_i32_0 : i32, i32
  }
  func.func @transform_3(%arg0: i32) -> (i32, i32) {
    %c0_i32 = arith.constant 0 : i32
    %c0_i32_0 = arith.constant 0 : i32
    %c0_i32_1 = arith.constant 0 : i32
    return %c0_i32, %c0_i32_0 : i32, i32
  }
  func.func @transform_4(%arg0: i32) -> (i32, i32) {
    %c0_i32 = arith.constant 0 : i32
    %c0_i32_0 = arith.constant 0 : i32
    %c0_i32_1 = arith.constant 0 : i32
    return %c0_i32, %c0_i32_0 : i32, i32
  }
  func.func @transform_5(%arg0: i32) -> (i32, i32) {
    %c0_i32 = arith.constant 0 : i32
    %c0_i32_0 = arith.constant 0 : i32
    return %arg0, %c0_i32 : i32, i32
  }
}

</mosaic_0001>

<bundles_post_ra>
// kernel: mlp_forward.1
= control target key start
LH: loop header
LB: loop body
LE: loop exit
PB: predicated region body
PF: predicated region fallthrough
CT: control target
= control target key end

     0   :  { %10 = vsyncpa [#allocation3], 0  ;;  %s853_s0 = inlined_call_operand.vmem [shape: f32[8,128], index: 0, kind: input, shape index: {}]   ;;  %s854_s1 = inlined_call_operand.hbm [shape: f32[128,128], index: 1, kind: input, shape index: {}]   ;;  %s855_s2 = inlined_call_operand.hbm [shape: f32[128,128], index: 2, kind: input, shape index: {}]   ;;  %s856_s3 = inlined_call_operand.hbm [shape: f32[128,128], index: 3, kind: input, shape index: {}]   ;;  %s857_s4 = inlined_call_operand.vmem [shape: f32[1,384], index: 4, kind: input, shape index: {}]   ;;  %s858_s5 = inlined_call_operand.hbm [shape: f32[8,128], index: 5, kind: output, shape index: {}]  }
   0x1   :  { %11 = vsyncpa [#allocation6], 0 }
   0x2   :  { %12 = vsyncpa [#allocation4], 0  ;;  %s708_s18 = smov [#allocation5]   ;;  %s709_s20 = smov [#allocation2]  }
   0x3   :  { %s32_s19 = sshll.u32 %s708_s18, 4  ;;  %s20_s21 = sshll.u32 %s709_s20, 4  ;;  %s33_s19 = int_to_ptr.vmem [resolvable:$true] %s32_s19  ;;  %s747_s21 = int_to_ptr.vmem [resolvable:$true] %s20_s21 }
   0x4   :  { %s614_s24 = scalar_lea.hbm %s855_s2, 2048 }
   0x5   :  { %p615_p0 = scmp.ne.s32.totalorder %s855_s2, %s614_s24  ;;  %p618_p1 = scmp.lt.u32.totalorder %s614_s24, %s855_s2 }
   0x7   :  { %p620_p2 = pnand %p618_p1, %p615_p0 }
   0x9   :  { %623 = shalt.err (!%p620_p2)
}
   0xa   :  { %s624_s29 = scalar_lea.vmem %s33_s19, 2048  ;;  %p629_p4 = scmp.lt.s32.totalorder %s33_s19, %s33_s19 }
   0xb   :  { %p625_p3 = scmp.ne.s32.totalorder %s33_s19, %s624_s29  ;;  %p630_p5 = scmp.lt.s32.totalorder %s624_s29, %s624_s29 }
   0xd   :  { %p631_p6 = por %p630_p5, %p629_p4 }
   0xf   :  { %p632_p7 = pnand %p631_p6, %p625_p3 }
  0x11   :  { %635 = shalt.err (!%p632_p7)
}
  0x12   :  { %s710_s30 = smov 128   ;;  %s711_s6 = smov 8  }
  0x13   :  { %38 = dma.hbm_to_vmem [thread:$0]  %s855_s2, 2048, %s33_s19, [#allocation6], %s710_s30, %s710_s30, %s711_s6  }
  0x14   :  { %s636_s11 = scalar_lea.hbm %s854_s1, 2048 }
  0x15   :  { %p637_p8 = scmp.ne.s32.totalorder %s854_s1, %s636_s11  ;;  %p640_p9 = scmp.lt.u32.totalorder %s636_s11, %s854_s1 }
  0x17   :  { %p642_p10 = pnand %p640_p9, %p637_p8 }
  0x19   :  { %645 = shalt.err (!%p642_p10)
}
  0x1a   :  { %s646_s16 = scalar_lea.vmem %s747_s21, 2048  ;;  %p651_p12 = scmp.lt.s32.totalorder %s747_s21, %s747_s21 }
  0x1b   :  { %p647_p11 = scmp.ne.s32.totalorder %s747_s21, %s646_s16  ;;  %p652_p13 = scmp.lt.s32.totalorder %s646_s16, %s646_s16 }
  0x1d   :  { %p653_p0 = por %p652_p13, %p651_p12 }
  0x1f   :  { %p654_p1 = pnand %p653_p0, %p647_p11 }
  0x21   :  { %657 = shalt.err (!%p654_p1)
}
  0x22   :  { %26 = dma.hbm_to_vmem [thread:$0]  %s854_s1, 2048, %s747_s21, [#allocation3], %s710_s30, %s710_s30, %s711_s6  }
  0x23   :  { %s712_s18 = smov [#allocation7]   ;;  %s658_s23 = scalar_lea.hbm %s856_s3, 2048 }
  0x24   :  { %s44_s19 = sshll.u32 %s712_s18, 4  ;;  %p659_p2 = scmp.ne.s32.totalorder %s856_s3, %s658_s23  ;;  %s45_s19 = int_to_ptr.vmem [resolvable:$true] %s44_s19 }
  0x25   :  { %p662_p3 = scmp.lt.u32.totalorder %s658_s23, %s856_s3 }
  0x27   :  { %p664_p4 = pnand %p662_p3, %p659_p2 }
  0x29   :  { %667 = shalt.err (!%p664_p4)
}
  0x2a   :  { %s668_s28 = scalar_lea.vmem %s45_s19, 2048  ;;  %p673_p6 = scmp.lt.s32.totalorder %s45_s19, %s45_s19 }
  0x2b   :  { %p669_p5 = scmp.ne.s32.totalorder %s45_s19, %s668_s28  ;;  %p674_p7 = scmp.lt.s32.totalorder %s668_s28, %s668_s28 }
  0x2d   :  { %p675_p8 = por %p674_p7, %p673_p6 }
  0x2f   :  { %p676_p9 = pnand %p675_p8, %p669_p5 }
  0x31   :  { %679 = shalt.err (!%p676_p9)
}
  0x32   :  { %50 = dma.hbm_to_vmem [thread:$0]  %s856_s3, 2048, %s45_s19, [#allocation6], %s710_s30, %s710_s30, %s711_s6  }
  0x33   :  { %702 = dma.done.wait [#allocation3], 2048  }
  0x34   :  { %703 = vsyncadd [#allocation3], 4294965248 }
  0x35   :  { %704 = dma.done.wait [#allocation6], 4096  }
  0x36   :  { %705 = vsyncadd [#allocation6], 4294963200  ;;  %v713_v0 = vmov 0.0|0.0   ;;  %vm714_vm0 = vmmov 0   ;;  %v715_v1 = vmov 0.0   ;;  %v63_v2 = vld [vmem:[#allocation2] sm:$0xff] }
  0x37   :  { %529 = vmatprep.subr.bf16.mxu0 %v713_v0  ;;  %456 = vmatprep.mubr.msk.f32.mxu0 %vm714_vm0, %v715_v1  ;;  %v64_v3 = vld [vmem:[#allocation2 + $0x8] sm:$0xff]  ;;  %v65_v4 = vld [vmem:[#allocation2 + $0x10] sm:$0xff]  ;;  %v66_v6 = vld [vmem:[#allocation2 + $0x18] sm:$0xff]  ;;  %s716_s10 = smov [#allocation8]  }
  0x38   :  { %553 = vmatprep.subr.bf16.mxu1 %v713_v0  ;;  %491 = vmatprep.mubr.msk.f32.mxu1 %vm714_vm0, %v715_v1  ;;  %v530_v5 = vpack.c.bf16 %v64_v3, %v63_v2  ;;  %v533_v7 = vpack.c.bf16 %v66_v6, %v65_v4  ;;  %v67_v8 = vld [vmem:[#allocation2 + $0x20] sm:$0xff]  ;;  %v68_v9 = vld [vmem:[#allocation2 + $0x28] sm:$0xff]  ;;  %v159_v12 = vld [vmem:[#allocation5 + $0x10] sm:$0xff]  ;;  %s360_s11 = sshll.u32 %s716_s10, 4  ;;  %s361_s11 = int_to_ptr.vmem [resolvable:$true] %s360_s11 }
  0x39   :  { %v157_v10 = vld [vmem:[#allocation5] sm:$0xff]  ;;  %v158_v11 = vld [vmem:[#allocation5 + $0x8] sm:$0xff]  ;;  %v160_v13 = vld [vmem:[#allocation5 + $0x18] sm:$0xff]  ;;  %v536_v14 = vpack.c.bf16 %v68_v9, %v67_v8  ;;  %s680_s12 = scalar_lea.vmem %s361_s11, 128  ;;  %p685_p11 = scmp.lt.s32.totalorder %s361_s11, %s361_s11 }
  0x3a   :  { %531 = vmatpush3.bf16.msra.mxu0 %v530_v5  ;;  %v554_v15 = vpack.c.bf16 %v158_v11, %v157_v10  ;;  %v69_v16 = vld [vmem:[#allocation2 + $0x30] sm:$0xff]  ;;  %v70_v17 = vld [vmem:[#allocation2 + $0x38] sm:$0xff]  ;;  %v557_v18 = vpack.c.bf16 %v160_v13, %v159_v12  ;;  %v161_v19 = vld [vmem:[#allocation5 + $0x20] sm:$0xff]  ;;  %p681_p10 = scmp.ne.s32.totalorder %s361_s11, %s680_s12  ;;  %p686_p12 = scmp.lt.s32.totalorder %s680_s12, %s680_s12 }
  0x3b   :  { %532 = vmatprep.subr.bf16.mxu0 %v713_v0  ;;  %v162_v20 = vld [vmem:[#allocation5 + $0x28] sm:$0xff]  ;;  %v539_v21 = vpack.c.bf16 %v70_v17, %v69_v16  ;;  %v71_v22 = vld [vmem:[#allocation2 + $0x40] sm:$0xff]  ;;  %v163_v25 = vld [vmem:[#allocation5 + $0x30] sm:$0xff] }
  0x3c   :  { %555 = vmatpush3.bf16.msra.mxu1 %v554_v15  ;;  %v72_v23 = vld [vmem:[#allocation2 + $0x48] sm:$0xff]  ;;  %v560_v24 = vpack.c.bf16 %v162_v20, %v161_v19  ;;  %v164_v26 = vld [vmem:[#allocation5 + $0x38] sm:$0xff]  ;;  %v73_v28 = vld [vmem:[#allocation2 + $0x50] sm:$0xff]  ;;  %p687_p13 = por %p686_p12, %p685_p11 }
  0x3d   :  { %556 = vmatprep.subr.bf16.mxu1 %v713_v0  ;;  %v542_v27 = vpack.c.bf16 %v72_v23, %v71_v22  ;;  %v74_v29 = vld [vmem:[#allocation2 + $0x58] sm:$0xff]  ;;  %v563_v30 = vpack.c.bf16 %v164_v26, %v163_v25  ;;  %v165_v31 = vld [vmem:[#allocation5 + $0x40] sm:$0xff]  ;;  %v166_v32 = vld [vmem:[#allocation5 + $0x48] sm:$0xff] }
  0x3e   :  { %534 = vmatpush3.bf16.msra.mxu0 %v533_v7  ;;  %v545_v33 = vpack.c.bf16 %v74_v29, %v73_v28  ;;  %v75_v34 = vld [vmem:[#allocation2 + $0x60] sm:$0xff]  ;;  %v76_v35 = vld [vmem:[#allocation2 + $0x68] sm:$0xff]  ;;  %v566_v36 = vpack.c.bf16 %v166_v32, %v165_v31  ;;  %v167_v37 = vld [vmem:[#allocation5 + $0x50] sm:$0xff]  ;;  %p688_p0 = pnand %p687_p13, %p681_p10 }
  0x3f   :  { %535 = vmatprep.subr.bf16.mxu0 %v713_v0  ;;  %v168_v38 = vld [vmem:[#allocation5 + $0x58] sm:$0xff]  ;;  %v548_v39 = vpack.c.bf16 %v76_v35, %v75_v34  ;;  %v77_v40 = vld [vmem:[#allocation2 + $0x70] sm:$0xff]  ;;  %v169_v43 = vld [vmem:[#allocation5 + $0x60] sm:$0xff] }
  0x40   :  { %558 = vmatpush3.bf16.msra.mxu1 %v557_v18  ;;  %v78_v41 = vld [vmem:[#allocation2 + $0x78] sm:$0xff]  ;;  %v569_v42 = vpack.c.bf16 %v168_v38, %v167_v37  ;;  %v170_v44 = vld [vmem:[#allocation5 + $0x68] sm:$0xff]  ;;  %v62_v47 = vld [vmem:[%s853_s0] sm:$0xff] }
  0x41   :  { %559 = vmatprep.subr.bf16.mxu1 %v713_v0  ;;  %v551_v45 = vpack.c.bf16 %v78_v41, %v77_v40  ;;  %v572_v46 = vpack.c.bf16 %v170_v44, %v169_v43  ;;  %v171_v48 = vld [vmem:[#allocation5 + $0x70] sm:$0xff]  ;;  %v172_v49 = vld [vmem:[#allocation5 + $0x78] sm:$0xff]  ;;  %v251_v51 = vld [vmem:[#allocation7] sm:$0xff] }
  0x42   :  { %537 = vmatpush3.bf16.msra.mxu0 %v536_v14  ;;  %v575_v50 = vpack.c.bf16 %v172_v49, %v171_v48  ;;  %v252_v52 = vld [vmem:[#allocation7 + $0x8] sm:$0xff]  ;;  %v253_v53 = vld [vmem:[#allocation7 + $0x10] sm:$0xff]  ;;  %v254_v55 = vld [vmem:[#allocation7 + $0x18] sm:$0xff] }
  0x43   :  { %538 = vmatprep.subr.bf16.mxu0 %v713_v0  ;;  %v578_v54 = vpack.c.bf16 %v252_v52, %v251_v51  ;;  %v581_v56 = vpack.c.bf16 %v254_v55, %v253_v53  ;;  %v255_v57 = vld [vmem:[#allocation7 + $0x20] sm:$0xff]  ;;  %v256_v58 = vld [vmem:[#allocation7 + $0x28] sm:$0xff]  ;;  %v257_v60 = vld [vmem:[#allocation7 + $0x30] sm:$0xff] }
  0x44   :  { %561 = vmatpush3.bf16.msra.mxu1 %v560_v24  ;;  %v584_v59 = vpack.c.bf16 %v256_v58, %v255_v57  ;;  %v258_v61 = vld [vmem:[#allocation7 + $0x38] sm:$0xff]  ;;  %v259_v63 = vld [vmem:[#allocation7 + $0x40] sm:$0xff]  ;;  %v261_v3 = vld [vmem:[#allocation7 + $0x50] sm:$0xff] }
  0x45   :  { %562 = vmatprep.subr.bf16.mxu1 %v713_v0  ;;  %v587_v62 = vpack.c.bf16 %v258_v61, %v257_v60  ;;  %v262_v4 = vld [vmem:[#allocation7 + $0x58] sm:$0xff]  ;;  %v263_v6 = vld [vmem:[#allocation7 + $0x60] sm:$0xff]  ;;  %v264_v7 = vld [vmem:[#allocation7 + $0x68] sm:$0xff] }
  0x46   :  { %540 = vmatpush3.bf16.msra.mxu0 %v539_v21  ;;  %v593_v5 = vpack.c.bf16 %v262_v4, %v261_v3  ;;  %v596_v8 = vpack.c.bf16 %v264_v7, %v263_v6  ;;  %v370_v9 = vld [vmem:[%s857_s4] ss:$0 sm:$0xff]  ;;  %v265_v14 = vld [vmem:[#allocation7 + $0x70] sm:$0xff]  ;;  %v266_v15 = vld [vmem:[#allocation7 + $0x78] sm:$0xff] }
  0x47   :  { %541 = vmatprep.subr.bf16.mxu0 %v713_v0  ;;  %v599_v16 = vpack.c.bf16 %v266_v15, %v265_v14  ;;  %v371_v17 = vld [vmem:[%s857_s4 + $0x1] ss:$0 sm:$0xff]  ;;  %v372_v21 = vld [vmem:[%s857_s4 + $0x2] ss:$0 sm:$0xff] }
  0x48   :  { %564 = vmatpush3.bf16.msra.mxu1 %v563_v30 }
  0x49   :  { %565 = vmatprep.subr.bf16.mxu1 %v713_v0 }
  0x4a   :  { %543 = vmatpush3.bf16.msra.mxu0 %v542_v27 }
  0x4b   :  { %544 = vmatprep.subr.bf16.mxu0 %v713_v0 }
  0x4c   :  { %567 = vmatpush3.bf16.msra.mxu1 %v566_v36 }
  0x4d   :  { %568 = vmatprep.subr.bf16.mxu1 %v713_v0 }
  0x4e   :  { %546 = vmatpush3.bf16.msra.mxu0 %v545_v33 }
  0x4f   :  { %547 = vmatprep.subr.bf16.mxu0 %v713_v0 }
  0x50   :  { %570 = vmatpush3.bf16.msra.mxu1 %v569_v42 }
  0x51   :  { %571 = vmatprep.subr.bf16.mxu1 %v713_v0 }
  0x52   :  { %549 = vmatpush3.bf16.msra.mxu0 %v548_v39 }
  0x53   :  { %550 = vmatprep.subr.bf16.mxu0 %v713_v0 }
  0x54   :  { %573 = vmatpush3.bf16.msra.mxu1 %v572_v46 }
  0x55   :  { %574 = vmatprep.subr.bf16.mxu1 %v713_v0 }
  0x56   :  { %552 = vmatpush3.bf16.msra.mxu0 %v551_v45 }
  0x57   :  { %577 = vmatprep.subr.bf16.mxu0 %v713_v0 }
  0x58   :  { %576 = vmatpush3.bf16.msra.mxu1 %v575_v50 }
  0x59   :  { %457 = vmatmul.mubr.f32.vlgmr.msra.gmra.mrb[0].mxu0 %v62_v47 }
  0x5a   :  { %526 = vmatprep.mubr.msk.f32.mxu0 %vm714_vm0, %v715_v1  ;;  %579 = vmatpush3.bf16.msra.mxu0 %v578_v54  ;;  %v260_v1 = vld [vmem:[#allocation7 + $0x48] sm:$0xff] }
  0x5b   :  { %580 = vmatprep.subr.bf16.mxu0 %v713_v0  ;;  %v590_v2 = vpack.c.bf16 %v260_v1, %v259_v63 }
  0x5e   :  { %582 = vmatpush3.bf16.msra.mxu0 %v581_v56 }
  0x5f   :  { %583 = vmatprep.subr.bf16.mxu0 %v713_v0 }
  0x62   :  { %585 = vmatpush3.bf16.msra.mxu0 %v584_v59 }
  0x63   :  { %586 = vmatprep.subr.bf16.mxu0 %v713_v0 }
  0x66   :  { %588 = vmatpush3.bf16.msra.mxu0 %v587_v62 }
  0x67   :  { %589 = vmatprep.subr.bf16.mxu0 %v713_v0 }
  0x6a   :  { %591 = vmatpush3.bf16.msra.mxu0 %v590_v2 }
  0x6b   :  { %592 = vmatprep.subr.bf16.mxu0 %v713_v0 }
  0x6e   :  { %594 = vmatpush3.bf16.msra.mxu0 %v593_v5 }
  0x6f   :  { %595 = vmatprep.subr.bf16.mxu0 %v713_v0 }
  0x72   :  { %597 = vmatpush3.bf16.msra.mxu0 %v596_v8 }
  0x73   :  { %598 = vmatprep.subr.bf16.mxu0 %v713_v0 }
  0x76   :  { %600 = vmatpush3.bf16.msra.mxu0 %v599_v16 }
 0x12c   :  { %v152_v10 = vpop.f32.mrb[0].mxu0 }
 0x12d   :  { %v153_v11 = vadd.f32 %v370_v9, %v152_v10  ;;  %v458_v12 = vpop.f32.mrb[1].mxu0 }
 0x12f   :  { %v156_v13 = vmax.f32 %v153_v11, 0.0 }
 0x131   :  { %492 = vmatmul.mubr.f32.vlgmr.msra.gmra.mrb[0].mxu1 %v156_v13 }
 0x204   :  { %v246_v18 = vpop.f32.mrb[0].mxu1 }
 0x205   :  { %v247_v19 = vadd.f32 %v371_v17, %v246_v18  ;;  %v493_v0 = vpop.f32.mrb[1].mxu1 }
 0x207   :  { %v250_v20 = vmax.f32 %v247_v19, 0.0 }
 0x209   :  { %527 = vmatmul.mubr.f32.vlgmr.msra.gmra.mrb[2].mxu0 %v250_v20 }
 0x2dc   :  { %v340_v22 = vpop.f32.mrb[2].mxu0 }
 0x2dd   :  { %v341_v23 = vadd.f32 %v372_v21, %v340_v22  ;;  %v528_v24 = vpop.f32.mrb[3].mxu0 }
 0x2df   :  { %v344_v25 = vand.u32 2147483647, %v341_v23  ;;  %vm350_vm1 = vcmp.ge.f32.partialorder %v341_v23, 0.0 }
 0x2e1   :  { %v345_v26 = vsub.f32 0.0, %v344_v25 }
 0x2e3   :  { %v346_v27 = vmul.f32 1.442695, %v345_v26 }
 0x2e5   :  { %610 = vpow2.f32 %v346_v27 }
 0x2ef   :  { %v611_v28 = vpop.eup %610 }
 0x2f0   :  { %v348_v29 = vadd.f32 1.0, %v611_v28 }
 0x2f2   :  { %612 = vrcp.f32 %v348_v29 }
 0x2fc   :  { %v613_v30 = vpop.eup %612 }
 0x2fd   :  { %v351_v31 = vmul.f32 %v613_v30, %v611_v28 }
 0x2ff   :  { %v352_v32 = vsel %vm350_vm1, %v613_v30, %v351_v31 }
 0x300   :  { %353 = vst [vmem:[#allocation8] sm:$0xff] %v352_v32 }
 0x301   :  { %691 = shalt.err (!%p688_p0)
}
 0x302   :  { %s692_s14 = scalar_lea.hbm %s858_s5, 128 }
 0x303   :  { %p693_p1 = scmp.ne.s32.totalorder %s858_s5, %s692_s14  ;;  %p696_p2 = scmp.lt.u32.totalorder %s692_s14, %s858_s5 }
 0x305   :  { %p698_p3 = pnand %p696_p2, %p693_p1 }
 0x307   :  { %701 = shalt.err (!%p698_p3)
}
 0x308   :  { %363 = dma.vmem_to_hbm [thread:$0]  %s361_s11, 128, %s858_s5, [#allocation4]  }
 0x309   :  { %706 = dma.done.wait [#allocation4], 128  }
 0x30a   :  { %707 = vsyncadd [#allocation4], 4294967168 }
 0x30b   :  { %367 = vsyncpa [#allocation3], 1 }
 0x30c   :  { %368 = vsyncpa [#allocation6], 1 }
 0x30d   :  { %369 = vsyncpa [#allocation4], 1 }

</bundles_post_ra>
